<compile_context>
chip_gen: v7x
topology: tpu7x:2x2x1
jax: 0.10.0
libtpu: 0.0.40
codegen_flags: <defaults>
</compile_context>

<pallas_src>
import jax
import jax.numpy as jnp
from jax import lax
from jax.experimental import pallas as pl
from jax.experimental.pallas import tpu as pltpu


def _round_up(x, m):
    return (x + m - 1) // m * m


def _mlp_kernel(emb_ref, wm_ref, bm_ref, h_ref):
    # emb_ref: [tn, D] bf16, wm_ref: [D, D] bf16 ([out, in]), bm_ref: [1, D] f32
    h = lax.dot_general(emb_ref[...], wm_ref[...],
                        dimension_numbers=(((1,), (1,)), ((), ())),
                        preferred_element_type=jnp.float32)          # [tn, D]
    h = jnp.maximum(h + bm_ref[...], 0.0)
    h_ref[...] = h.astype(h_ref.dtype)


def _logits_kernel(h_ref, w_ref, bo_ref, out_ref):
    # h_ref: [tn, D] bf16, w_ref: [tv, D] bf16 (tied weight V-tile), bo_ref: [1, tv] f32
    logits = lax.dot_general(h_ref[...], w_ref[...],
                             dimension_numbers=(((1,), (1,)), ((), ())),
                             preferred_element_type=jnp.float32)     # [tn, tv]
    out_ref[...] = logits + bo_ref[...]


def composition_stateless_sequential(ids, tied_w, w_mid, b_mid, b_out):
    """ids: [B, S] int; returns logits [B, S, V] float32."""
    B, S = ids.shape
    V, D = tied_w.shape
    N = B * S

    # Tile sizes: tn multiple of 8 (sublane), tv lane-dense multiple of 128.
    TN = min(512, _round_up(max(N, 8), 8))
    N_pad = _round_up(N, TN)
    TV = min(512, _round_up(V, 128))
    V_pad = _round_up(V, TV)

    ids_flat = ids.reshape(-1).astype(jnp.int32)

    # Embedding gather in the wrapper (XLA gather); rows cast to bf16 for the MXU.
    emb = jnp.take(tied_w, ids_flat, axis=0).astype(jnp.bfloat16)          # [N, D]
    emb_pad = jnp.zeros((N_pad, D), jnp.bfloat16).at[:N].set(emb)

    wm_bf16 = w_mid.astype(jnp.bfloat16)                                   # [D, D]
    bm2 = b_mid.astype(jnp.float32).reshape(1, D)
    w_bf16 = jnp.zeros((V_pad, D), jnp.bfloat16).at[:V, :].set(
        tied_w.astype(jnp.bfloat16))
    bo2 = jnp.zeros((1, V_pad), jnp.float32).at[:, :V].set(
        b_out.astype(jnp.float32).reshape(1, V))

    # ---- Kernel A: h = relu(emb @ Wm.T + bm), tiled over N ----
    h = pl.pallas_call(
        _mlp_kernel,
        out_shape=jax.ShapeDtypeStruct((N_pad, D), jnp.bfloat16),
        grid_spec=pl.GridSpec(
            grid=(N_pad // TN,),
            in_specs=[
                pl.BlockSpec((TN, D), lambda n: (n, 0)),     # emb N-tile
                pl.BlockSpec((D, D), lambda n: (0, 0)),      # w_mid (resident)
                pl.BlockSpec((1, D), lambda n: (0, 0)),      # b_mid (resident)
            ],
            out_specs=pl.BlockSpec((TN, D), lambda n: (n, 0)),
        ),
        compiler_params=pltpu.CompilerParams(
            dimension_semantics=("parallel",),
            vmem_limit_bytes=64 * 1024 * 1024),
        cost_estimate=pl.CostEstimate(
            flops=2 * N_pad * D * D, transcendentals=0,
            bytes_accessed=N_pad * D * 2 * 2 + D * D * 2 + D * 4),
    )(emb_pad, wm_bf16, bm2)

    # ---- Kernel B: out = h @ tied_w.T + b_out, grid (N tiles, V tiles) ----
    # h block index is constant over the inner V axis -> DMA'd once per N-tile.
    flops = 2 * N_pad * D * V_pad
    bytes_accessed = (N_pad * D * 2                       # h (read once per N-tile)
                      + (N_pad // TN) * V_pad * D * 2     # tied_w streamed per N-tile
                      + V_pad * 4                         # b_out
                      + N_pad * V_pad * 4)                # logits out
    out = pl.pallas_call(
        _logits_kernel,
        out_shape=jax.ShapeDtypeStruct((N_pad, V_pad), jnp.float32),
        grid_spec=pl.GridSpec(
            grid=(N_pad // TN, V_pad // TV),
            in_specs=[
                pl.BlockSpec((TN, D), lambda n, v: (n, 0)),   # h N-tile (reused over v)
                pl.BlockSpec((TV, D), lambda n, v: (v, 0)),   # tied weight V-tile
                pl.BlockSpec((1, TV), lambda n, v: (0, v)),   # b_out V-tile
            ],
            out_specs=pl.BlockSpec((TN, TV), lambda n, v: (n, v)),
        ),
        compiler_params=pltpu.CompilerParams(
            dimension_semantics=("parallel", "arbitrary"),
            vmem_limit_bytes=64 * 1024 * 1024),
        cost_estimate=pl.CostEstimate(flops=flops, transcendentals=0,
                                      bytes_accessed=bytes_accessed),
    )(h, w_bf16, bo2)

    return out[:N, :V].reshape(B, S, V)


def _reference(ids, tied_w, w_mid, b_mid, b_out):
    emb = tied_w[ids]                                     # [B, S, D]
    h = jnp.maximum(emb @ w_mid.T + b_mid, 0.0)           # [B, S, D]
    return h @ tied_w.T + b_out                           # [B, S, V]


if __name__ == "__main__":
    B, S = 2, 8          # batch, sequence
    V, D = 32, 32        # vocab (num_embeddings), embedding_dim / hidden

    key = jax.random.PRNGKey(0)
    k_ids, k_w, k_wm, k_bm, k_bo = jax.random.split(key, 5)

    ids = jax.random.randint(k_ids, (B, S), 0, V, dtype=jnp.int32)
    tied_w = jax.random.normal(k_w, (V, D), dtype=jnp.float32) * 0.1
    w_mid = jax.random.normal(k_wm, (D, D), dtype=jnp.float32) * 0.1
    b_mid = jax.random.normal(k_bm, (D,), dtype=jnp.float32) * 0.1
    b_out = jax.random.normal(k_bo, (V,), dtype=jnp.float32) * 0.1

    out = composition_stateless_sequential(ids, tied_w, w_mid, b_mid, b_out)
    out = jax.block_until_ready(out)

    ref = _reference(ids, tied_w, w_mid, b_mid, b_out)
    assert out.shape == (B, S, V), out.shape
    # bf16 MXU operands with f32 accumulation: tolerance loosened vs the pure-f32 reference.
    assert jnp.allclose(out, ref, atol=2e-2, rtol=2e-2), "mismatch vs reference"

    print("KERNEL_OK")
</pallas_src>

<mosaic_0001>
module attributes {stable_mosaic.version = 11 : i64} {
  func.func @_mlp_kernel(%arg0: i32, %arg1: memref<16x32xbf16, #tpu.memory_space<vmem>>, %arg2: memref<32x32xbf16, #tpu.memory_space<vmem>>, %arg3: memref<1x32xf32, #tpu.memory_space<vmem>>, %arg4: memref<16x32xbf16, #tpu.memory_space<vmem>>) attributes {dimension_semantics = [#tpu.dimension_semantics<parallel>], iteration_bounds = array<i64: 1>, scalar_prefetch = 0 : i64, scratch_operands = 0 : i64, tpu.core_type = #tpu.core_type<tc>, window_params = [{transform_indices = @transform_0, window_bounds = array<i64: 16, 32>}, {pipeline_mode = #tpu.pipeline_mode<synchronous>, transform_indices = @transform_1, window_bounds = array<i64: 32, 32>}, {pipeline_mode = #tpu.pipeline_mode<synchronous>, transform_indices = @transform_2, window_bounds = array<i64: 1, 32>}, {transform_indices = @transform_3, window_bounds = array<i64: 16, 32>}]} {
    %c0 = arith.constant 0 : index
    %c0_0 = arith.constant 0 : index
    %0 = vector.load %arg1[%c0, %c0_0] : memref<16x32xbf16, #tpu.memory_space<vmem>>, vector<16x32xbf16>
    %c0_1 = arith.constant 0 : index
    %c0_2 = arith.constant 0 : index
    %1 = vector.load %arg2[%c0_1, %c0_2] : memref<32x32xbf16, #tpu.memory_space<vmem>>, vector<32x32xbf16>
    %cst = arith.constant dense<0.000000e+00> : vector<16x32xf32>
    %2 = tpu.matmul %0, %1, %cst {dimension_numbers = #tpu.dot_dimension_numbers<[1], [1], [0], [0], [0, 0, 1, 0], [], []>} : vector<16x32xbf16>, vector<32x32xbf16>, vector<16x32xf32> -> vector<16x32xf32>
    %c0_3 = arith.constant 0 : index
    %c0_4 = arith.constant 0 : index
    %3 = vector.load %arg3[%c0_3, %c0_4] : memref<1x32xf32, #tpu.memory_space<vmem>>, vector<1x32xf32>
    %4 = vector.broadcast %3 : vector<1x32xf32> to vector<16x32xf32>
    %5 = arith.addf %2, %4 : vector<16x32xf32>
    %cst_5 = arith.constant 0.000000e+00 : f32
    %6 = vector.broadcast %cst_5 : f32 to vector<16x32xf32>
    %7 = arith.maximumf %5, %6 : vector<16x32xf32>
    %8 = arith.truncf %7 : vector<16x32xf32> to vector<16x32xbf16>
    %c0_6 = arith.constant 0 : index
    %c0_7 = arith.constant 0 : index
    %9 = vector.load %arg4[%c0_6, %c0_7] : memref<16x32xbf16, #tpu.memory_space<vmem>>, vector<16x32xbf16>
    tpu.vector_store %arg4[%c0_6, %c0_7], %8 {strides = array<i32>} : memref<16x32xbf16, #tpu.memory_space<vmem>>, vector<16x32xbf16>,
    return
  }
  func.func @transform_0(%arg0: i32) -> (i32, i32) {
    %c0_i32 = arith.constant 0 : i32
    %c0_i32_0 = arith.constant 0 : i32
    return %arg0, %c0_i32 : i32, i32
  }
  func.func @transform_1(%arg0: i32) -> (i32, i32) {
    %c0_i32 = arith.constant 0 : i32
    %c0_i32_0 = arith.constant 0 : i32
    %c0_i32_1 = arith.constant 0 : i32
    return %c0_i32, %c0_i32_0 : i32, i32
  }
  func.func @transform_2(%arg0: i32) -> (i32, i32) {
    %c0_i32 = arith.constant 0 : i32
    %c0_i32_0 = arith.constant 0 : i32
    %c0_i32_1 = arith.constant 0 : i32
    return %c0_i32, %c0_i32_0 : i32, i32
  }
  func.func @transform_3(%arg0: i32) -> (i32, i32) {
    %c0_i32 = arith.constant 0 : i32
    %c0_i32_0 = arith.constant 0 : i32
    return %arg0, %c0_i32 : i32, i32
  }
}

</mosaic_0001>

<bundles_post_ra>
// kernel: tpu_custom_call.1
= control target key start
LH: loop header
LB: loop body
LE: loop exit
PB: predicated region body
PF: predicated region fallthrough
CT: control target
= control target key end

     0   :  { %8 = vsyncpa [#allocation3], 0  ;;  %s382_s0 = inlined_call_operand.hbm [shape: bf16[16,32], index: 0, kind: input, shape index: {}]   ;;  %s383_s1 = inlined_call_operand.hbm [shape: bf16[32,32], index: 1, kind: input, shape index: {}]   ;;  %s384_s2 = inlined_call_operand.hbm [shape: f32[1,32], index: 2, kind: input, shape index: {}]   ;;  %s385_s3 = inlined_call_operand.hbm [shape: bf16[16,32], index: 3, kind: output, shape index: {}]  }
   0x1   :  { %9 = vsyncpa [#allocation6], 0 }
   0x2   :  { %10 = vsyncpa [#allocation4], 0  ;;  %s290_s12 = smov [#allocation5]   ;;  %s291_s14 = smov [#allocation2]  }
   0x3   :  { %s28_s13 = sshll.u32 %s290_s12, 4  ;;  %s16_s15 = sshll.u32 %s291_s14, 4  ;;  %s29_s13 = int_to_ptr.vmem [resolvable:$true] %s28_s13  ;;  %s318_s15 = int_to_ptr.vmem [resolvable:$true] %s16_s15 }
   0x4   :  { %s196_s18 = scalar_lea.hbm %s383_s1, 256 }
   0x5   :  { %p197_p0 = scmp.ne.s32.totalorder %s383_s1, %s196_s18  ;;  %p200_p1 = scmp.lt.u32.totalorder %s196_s18, %s383_s1 }
   0x7   :  { %p202_p2 = pnand %p200_p1, %p197_p0 }
   0x9   :  { %205 = shalt.err (!%p202_p2)
}
   0xa   :  { %s206_s23 = scalar_lea.vmem %s29_s13, 256  ;;  %p211_p4 = scmp.lt.s32.totalorder %s29_s13, %s29_s13 }
   0xb   :  { %p207_p3 = scmp.ne.s32.totalorder %s29_s13, %s206_s23  ;;  %p212_p5 = scmp.lt.s32.totalorder %s206_s23, %s206_s23 }
   0xd   :  { %p213_p6 = por %p212_p5, %p211_p4 }
   0xf   :  { %p214_p7 = pnand %p213_p6, %p207_p3 }
  0x11   :  { %217 = shalt.err (!%p214_p7)
}
  0x12   :  { %s292_s24 = smov 64   ;;  %s293_s25 = smov 4  }
  0x13   :  { %34 = dma.hbm_to_vmem [thread:$0]  %s383_s1, 256, %s29_s13, [#allocation6], %s292_s24, %s292_s24, %s293_s25  }
  0x14   :  { %s218_s30 = scalar_lea.hbm %s382_s0, 128 }
  0x15   :  { %p219_p8 = scmp.ne.s32.totalorder %s382_s0, %s218_s30  ;;  %p222_p9 = scmp.lt.u32.totalorder %s218_s30, %s382_s0 }
  0x17   :  { %p224_p10 = pnand %p222_p9, %p219_p8 }
  0x19   :  { %227 = shalt.err (!%p224_p10)
}
  0x1a   :  { %s228_s8 = scalar_lea.vmem %s318_s15, 128  ;;  %p233_p12 = scmp.lt.s32.totalorder %s318_s15, %s318_s15 }
  0x1b   :  { %p229_p11 = scmp.ne.s32.totalorder %s318_s15, %s228_s8  ;;  %p234_p13 = scmp.lt.s32.totalorder %s228_s8, %s228_s8 }
  0x1d   :  { %p235_p0 = por %p234_p13, %p233_p12 }
  0x1f   :  { %p236_p1 = pnand %p235_p0, %p229_p11 }
  0x21   :  { %239 = shalt.err (!%p236_p1)
}
  0x22   :  { %22 = dma.hbm_to_vmem [thread:$0]  %s382_s0, 128, %s318_s15, [#allocation3], %s292_s24, %s292_s24, %s293_s25  }
  0x23   :  { %s294_s10 = smov [#allocation7]   ;;  %s240_s14 = scalar_lea.hbm %s384_s2, 16 }
  0x24   :  { %s41_s11 = sshll.u32 %s294_s10, 4  ;;  %p241_p2 = scmp.ne.s32.totalorder %s384_s2, %s240_s14  ;;  %s42_s11 = int_to_ptr.vmem [resolvable:$true] %s41_s11 }
  0x25   :  { %p244_p3 = scmp.lt.u32.totalorder %s240_s14, %s384_s2 }
  0x27   :  { %p246_p4 = pnand %p244_p3, %p241_p2 }
  0x29   :  { %249 = shalt.err (!%p246_p4)
}
  0x2a   :  { %s250_s20 = scalar_lea.vmem %s42_s11, 16  ;;  %s254_s0 = scalar_lea.vmem %s42_s11, 32 }
  0x2b   :  { %p251_p5 = scmp.ne.s32.totalorder %s42_s11, %s250_s20  ;;  %p255_p6 = scmp.lt.s32.totalorder %s42_s11, %s42_s11 }
  0x2c   :  { %p256_p7 = scmp.lt.s32.totalorder %s254_s0, %s250_s20 }
  0x2e   :  { %p257_p8 = por %p256_p7, %p255_p6 }
  0x30   :  { %p258_p9 = pnand %p257_p8, %p251_p5 }
  0x32   :  { %261 = shalt.err (!%p258_p9)
}
  0x33   :  { %44 = dma.hbm_to_vmem [thread:$0]  %s384_s2, 16, %s42_s11, [#allocation6]  }
  0x34   :  { %284 = dma.done.wait [#allocation3], 128  }
  0x35   :  { %285 = vsyncadd [#allocation3], 4294967168 }
  0x36   :  { %286 = dma.done.wait [#allocation6], 272  }
  0x37   :  { %287 = vsyncadd [#allocation6], 4294967024  ;;  %v295_v0 = vmov 0.0   ;;  %vm296_vm0 = vmmov 0   ;;  %vm83_vm1 = vcmask 261120   ;;  %v193_v1 = vld [vmem:[#allocation5] sm:$0xff]  }
  0x38   :  { %177 = vmatprep.subr.bf16.mxu0 %v295_v0  ;;  %181 = vmatprep.mubr.msk.bf16.mxu0 %vm296_vm0, %v295_v0  ;;  %v88_v2 = vsel %vm83_vm1, %v193_v1, 0  ;;  %v194_v3 = vld [vmem:[#allocation5 + $0x8] sm:$0xff]   ;;  %v195_v5 = vld [vmem:[#allocation2] sm:$0xff]   ;;  %v165_v6 = vld [vmem:[#allocation7] ss:$0 sm:$0xff]  ;;  %vm144_vm2 = vcmask 257024  }
  0x39   :  { %178 = vmatpush3.bf16.xpose.msra.mxu0 %v88_v2  ;;  %v91_v4 = vsel %vm83_vm1, %v194_v3, 0  ;;  %s297_s2 = smov [#allocation8]  }
  0x3a   :  { %179 = vmatprep.subr.bf16.mxu0 %v295_v0  ;;  %s152_s22 = sshll.u32 %s297_s2, 4  ;;  %s153_s22 = int_to_ptr.vmem [resolvable:$true] %s152_s22 }
  0x3b   :  { %s262_s23 = scalar_lea.vmem %s153_s22, 128  ;;  %p267_p11 = scmp.lt.s32.totalorder %s153_s22, %s153_s22 }
  0x3c   :  { %p263_p10 = scmp.ne.s32.totalorder %s153_s22, %s262_s23  ;;  %p268_p12 = scmp.lt.s32.totalorder %s262_s23, %s262_s23 }
  0x3e   :  { %p269_p13 = por %p268_p12, %p267_p11 }
  0x40   :  { %p270_p0 = pnand %p269_p13, %p263_p10 }
  0x41   :  { %180 = vmatpush3.bf16.xpose.msra.mxu0 %v91_v4 }
  0x48   :  { %182 = vmatmul.mubr.msk.bf16.vlgmr.msra.gmra.mrb[0].mxu0 %vm83_vm1, %v195_v5 }
 0x11b   :  { %v127_v7 = vpop.f32.mrb[0].mxu0 }
 0x11c   :  { %v128_v8 = vadd.f32 %v165_v6, %v127_v7  ;;  %v183_v9 = vpop.f32.mrb[1].mxu0 }
 0x11d   :  { %v130_v10 = vpop.f32.mrb[2].mxu0 }
 0x11e   :  { %v134_v11 = vmax.f32 %v128_v8, 0.0  ;;  %v131_v12 = vadd.f32 %v165_v6, %v130_v10  ;;  %v184_v13 = vpop.f32.mrb[3].mxu0 }
 0x120   :  { %v172_v14 = vpack.c.bf16 %v134_v11, %v134_v11  ;;  %v135_v15 = vmax.f32 %v131_v12, 0.0 }
 0x122   :  { %v173_v16 = vpack.c.bf16 %v135_v15, %v135_v15  ;;  %145 = vst.msk [vmem:[#allocation8] sm:$0xf] %vm144_vm2, %v172_v14 }
 0x124   :  { %146 = vst.msk [vmem:[#allocation8 + $0x4] sm:$0xf] %vm144_vm2, %v173_v16 }
 0x125   :  { %273 = shalt.err (!%p270_p0)
}
 0x126   :  { %s274_s28 = scalar_lea.hbm %s385_s3, 128 }
 0x127   :  { %p275_p1 = scmp.ne.s32.totalorder %s385_s3, %s274_s28  ;;  %p278_p2 = scmp.lt.u32.totalorder %s274_s28, %s385_s3 }
 0x129   :  { %p280_p3 = pnand %p278_p2, %p275_p1 }
 0x12b   :  { %283 = shalt.err (!%p280_p3)
}
 0x12c   :  { %158 = dma.vmem_to_hbm [thread:$0]  %s153_s22, 128, %s385_s3, [#allocation4], %s292_s24, %s292_s24, %s293_s25  }
 0x12d   :  { %288 = dma.done.wait [#allocation4], 128  }
 0x12e   :  { %289 = vsyncadd [#allocation4], 4294967168 }
 0x12f   :  { %162 = vsyncpa [#allocation3], 1 }
 0x130   :  { %163 = vsyncpa [#allocation6], 1 }
 0x131   :  { %164 = vsyncpa [#allocation4], 1 }

</bundles_post_ra>
